<compile_context>
chip_gen: v7x
topology: tpu7x:2x2x1
jax: 0.10.0
libtpu: 0.0.40
codegen_flags: <defaults>
</compile_context>

<pallas_src>
import functools

import jax
import jax.numpy as jnp
from jax.experimental import pallas as pl
from jax.experimental.pallas import tpu as pltpu


def _round_up(x, m):
    return ((x + m - 1) // m) * m


def _focal_loss_kernel(labels_ref, logits_ref, alpha_ref, out_ref, *,
                       gamma, use_alpha, partial_sum, m_total, tw):
    """Processes one (C, TW) tile: classes in sublanes, spatial cols in lanes."""
    logits = logits_ref[0].astype(jnp.float32)          # (C, TW)
    labels = labels_ref[0]                               # (1, TW) int32
    C, TW = logits.shape

    # Target mask rebuilt in-kernel (replaces streaming a dense one_hot).
    cls = jax.lax.broadcasted_iota(jnp.int32, (C, TW), 0)
    tgt = cls == labels                                   # (C, TW) bool

    # Log-sum-exp softmax over the class (sublane) axis.
    m = jnp.max(logits, axis=0, keepdims=True)                         # (1, TW)
    shifted = logits - m                                               # (C, TW)
    lse = jnp.log(jnp.sum(jnp.exp(shifted), axis=0, keepdims=True))    # (1, TW)
    t = jnp.sum(jnp.where(tgt, shifted, 0.0), axis=0, keepdims=True)   # (1, TW)

    # Direct log-prob of the target class.  The reference's log(p + 1e-9)
    # differs only when pt underflows (far below test tolerance).
    log_pt = t - lse
    pt = jnp.exp(log_pt)

    one_m = 1.0 - pt
    g = float(gamma)
    if g == 2.0:
        focal = one_m * one_m
    elif g == 1.0:
        focal = one_m
    elif g == 0.0:
        focal = jnp.ones_like(one_m)
    else:
        focal = one_m ** g

    loss = -focal * log_pt                                             # (1, TW)

    if use_alpha:
        alpha = alpha_ref[...].astype(jnp.float32)                     # (C, 1)
        # Hard one-hot targets -> identical to alpha[argmax(one_hot)].
        alpha_t = jnp.sum(jnp.where(tgt, alpha, 0.0), axis=0, keepdims=True)
        loss = loss * alpha_t

    if partial_sum:
        # Mask ragged-tail columns (garbage reads) before reducing.
        i = pl.program_id(1)
        col = jax.lax.broadcasted_iota(jnp.int32, (1, TW), 1) + i * tw
        loss = jnp.where(col < m_total, loss, 0.0)
        out_ref[0, 0] = jnp.sum(loss, keepdims=True)                   # (1, 1)
    else:
        out_ref[0] = loss                                              # (1, TW)


class MultiClassFocalLoss:
    """JAX/Pallas port of the PyTorch MultiClassFocalLoss module (forward)."""

    def __init__(self, class_counts=None, gamma=2.0, alpha=1.0, smoothing=0.0,
                 reduction='mean'):
        self.gamma = float(gamma)
        # TODO(synk): `smoothing` is accepted but unused, matching the reference
        # forward() which never applies it.
        self.smoothing = smoothing
        self.reduction = reduction
        if class_counts is not None:
            counts = jnp.asarray(class_counts, dtype=jnp.float32)
            counts = jnp.where(counts == 0, 1.0, counts)
            a = 1.0 / counts
            self.alpha = a / jnp.sum(a)
        else:
            self.alpha = None

    def __call__(self, logits, one_hot):
        # Canonicalize to (G, C, M) with the class axis second (sublanes) and
        # int32 labels of shape (G, 1, M).
        # TODO(synk): the kernel assumes strictly hard one-hot targets (same
        # assumption the review flagged); soft / all-zero rows deviate from
        # the reference's sum(probs * one_hot) semantics.
        if logits.ndim == 4 and logits.shape[-1] != 19:
            # NCHW input: pure reshape, no HBM transpose.
            B, C, H, W = logits.shape
            G, M = B, H * W
            logits3d = logits.reshape(B, C, M)
            labels = jnp.argmax(one_hot.reshape(B, M, C), axis=-1)
        elif logits.ndim == 4:
            # Already-NHWC heuristic (last dim == 19), copied verbatim from the
            # reference.  Needs one transpose to put classes in sublanes.
            B, H, W, C = logits.shape
            G, M = B, H * W
            logits3d = jnp.transpose(logits.reshape(B, M, C), (0, 2, 1))
            labels = jnp.argmax(one_hot.reshape(B, M, C), axis=-1)
        else:
            # (B, C) convenience path (the PyTorch reference actually errors
            # on 2-D input when unpacking 4 dims).
            B, C = logits.shape
            G, M = 1, B
            logits3d = jnp.transpose(logits, (1, 0)).reshape(1, C, B)
            labels = jnp.argmax(one_hot.reshape(B, C), axis=-1).reshape(1, B)

        labels3d = labels.astype(jnp.int32).reshape(G, 1, M)

        use_alpha = self.alpha is not None
        if use_alpha:
            alpha2d = jnp.asarray(self.alpha, jnp.float32).reshape(C, 1)
        else:
            alpha2d = jnp.ones((C, 1), jnp.float32)

        # --- Tile sizing, derived per TPU generation ---------------------
        try:
            vmem_phys = int(pltpu.get_tpu_info().vmem_capacity_bytes)
        except Exception:
            vmem_phys = 64 * 1024 * 1024                 # conservative default
        vmem_limit = min(max(vmem_phys // 2, 32 * 1024 * 1024), 64 * 1024 * 1024)
        block_budget = max(2 * 1024 * 1024, vmem_phys // 32)   # ~2 MiB v7x, 4 MiB v5e/v6e

        c_pad = _round_up(max(C, 8), 8)
        # Per-column VMEM bytes: logits tile (f32 upper bound) + padded labels
        # and output tiles.
        per_col_bytes = (c_pad + 16) * 4
        tw_cap = max(128, (block_budget // per_col_bytes) // 128 * 128)

        if M <= 128:
            TW = M                                        # full-dim block
        else:
            TW = min(tw_cap, _round_up(M, 128))
            # Guarantee >= 2 grid steps so megacore (v7x) + pipelining engage.
            if G * pl.cdiv(M, TW) < 2:
                TW = max(128, _round_up(pl.cdiv(M, 2), 128))
        n_w = pl.cdiv(M, TW)
        grid = (G, n_w)

        partial_sum = self.reduction in ('mean', 'sum')
        kernel = functools.partial(
            _focal_loss_kernel, gamma=self.gamma, use_alpha=use_alpha,
            partial_sum=partial_sum, m_total=M, tw=TW)

        in_specs = [
            pl.BlockSpec((1, 1, TW), lambda g, i: (g, 0, i)),   # labels
            pl.BlockSpec((1, C, TW), lambda g, i: (g, 0, i)),   # logits
            pl.BlockSpec((C, 1), lambda g, i: (0, 0)),          # alpha
        ]
        if partial_sum:
            out_shape = jax.ShapeDtypeStruct((G, n_w, 1, 1), jnp.float32)
            out_specs = pl.BlockSpec((1, 1, 1, 1), lambda g, i: (g, i, 0, 0))
        else:
            out_shape = jax.ShapeDtypeStruct((G, 1, M), jnp.float32)
            out_specs = pl.BlockSpec((1, 1, TW), lambda g, i: (g, 0, i))

        out = pl.pallas_call(
            kernel,
            out_shape=out_shape,
            grid_spec=pltpu.PrefetchScalarGridSpec(
                num_scalar_prefetch=0,
                grid=grid,
                in_specs=in_specs,
                out_specs=out_specs,
            ),
            compiler_params=pltpu.CompilerParams(
                dimension_semantics=("parallel", "parallel"),
                vmem_limit_bytes=vmem_limit,
            ),
        )(labels3d, logits3d, alpha2d)

        if self.reduction == 'mean':
            return jnp.sum(out) / (G * M)
        if self.reduction == 'sum':
            return jnp.sum(out)
        return out.reshape(G * M)


def _reference(logits, one_hot, alpha, gamma, reduction):
    """Pure-JAX reference mirroring the PyTorch forward."""
    if logits.ndim == 4 and logits.shape[-1] != 19:
        logits = jnp.transpose(logits, (0, 2, 3, 1))
    C = logits.shape[-1]
    logits = logits.reshape(-1, C)
    one_hot = one_hot.reshape(-1, C)
    probs = jax.nn.softmax(logits, axis=-1)
    log_probs = jnp.log(probs + 1e-9)
    pt = jnp.sum(probs * one_hot, axis=1)
    log_pt = jnp.sum(log_probs * one_hot, axis=1)
    loss = -((1.0 - pt) ** gamma) * log_pt
    if alpha is not None:
        idx = jnp.argmax(one_hot, axis=1)
        loss = loss * alpha[idx]
    if reduction == 'mean':
        return loss.mean()
    if reduction == 'sum':
        return loss.sum()
    return loss


if __name__ == "__main__":
    key = jax.random.PRNGKey(0)
    B, C, H, W = 2, 4, 16, 16
    k1, k2 = jax.random.split(key)

    # logits in PyTorch NCHW layout
    logits = jax.random.normal(k1, (B, C, H, W), dtype=jnp.float32)
    # one-hot targets in (B, H, W, C) layout (matches permuted logits)
    labels = jax.random.randint(k2, (B, H, W), 0, C)
    one_hot = jax.nn.one_hot(labels, C, dtype=jnp.float32)

    class_counts = [10.0, 3.0, 7.0, 1.0]   # deterministic synthetic counts

    # reduction='mean' with per-class alpha (exercises the partial-sum path)
    loss_fn = MultiClassFocalLoss(class_counts=class_counts, gamma=2.0,
                                  reduction='mean')
    out = jax.block_until_ready(loss_fn(logits, one_hot))
    ref = _reference(logits, one_hot, loss_fn.alpha, 2.0, 'mean')
    assert jnp.allclose(out, ref, rtol=1e-4, atol=1e-6), (out, ref)

    # reduction='none' without alpha (exercises the per-element path)
    loss_fn_none = MultiClassFocalLoss(gamma=2.0, reduction='none')
    out_none = jax.block_until_ready(loss_fn_none(logits, one_hot))
    ref_none = _reference(logits, one_hot, None, 2.0, 'none')
    assert jnp.allclose(out_none, ref_none, rtol=1e-4, atol=1e-6)

    print("KERNEL_OK")
</pallas_src>

<mosaic_0001>
module attributes {stable_mosaic.version = 11 : i64} {
  func.func @_focal_loss_kernel(%arg0: i32, %arg1: i32, %arg2: memref<1x1x256xi32, #tpu.memory_space<vmem>>, %arg3: memref<1x4x256xf32, #tpu.memory_space<vmem>>, %arg4: memref<4x1xf32, #tpu.memory_space<vmem>>, %arg5: memref<1x1x1x1xf32, #tpu.memory_space<vmem>>) attributes {dimension_semantics = [#tpu.dimension_semantics<parallel>, #tpu.dimension_semantics<parallel>], iteration_bounds = array<i64: 2, 1>, scalar_prefetch = 0 : i64, scratch_operands = 0 : i64, tpu.core_type = #tpu.core_type<tc>, window_params = [{transform_indices = @transform_0, window_bounds = array<i64: 1, 1, 256>}, {transform_indices = @transform_1, window_bounds = array<i64: 1, 4, 256>}, {pipeline_mode = #tpu.pipeline_mode<synchronous>, transform_indices = @transform_2, window_bounds = array<i64: 4, 1>}, {transform_indices = @transform_3, window_bounds = array<i64: 1, 1, 1, 1>}]} {
    %c0 = arith.constant 0 : index
    %c0_0 = arith.constant 0 : index
    %c0_1 = arith.constant 0 : index
    %0 = vector.load %arg3[%c0, %c0_0, %c0_1] : memref<1x4x256xf32, #tpu.memory_space<vmem>>, vector<1x4x256xf32>
    %1 = vector.shape_cast %0 : vector<1x4x256xf32> to vector<4x256xf32>
    %c0_2 = arith.constant 0 : index
    %c0_3 = arith.constant 0 : index
    %c0_4 = arith.constant 0 : index
    %2 = vector.load %arg2[%c0_2, %c0_3, %c0_4] : memref<1x1x256xi32, #tpu.memory_space<vmem>>, vector<1x1x256xi32>
    %3 = vector.shape_cast %2 : vector<1x1x256xi32> to vector<1x256xi32>
    %4 = tpu.iota {dimensions = array<i32: 0>} : vector<4x256xi32>
    %5 = vector.broadcast %3 : vector<1x256xi32> to vector<4x256xi32>
    %6 = arith.cmpi eq, %4, %5 : vector<4x256xi32>
    %cst = arith.constant dense<0xFF800000> : vector<256xf32>
    %7 = vector.multi_reduction <maximumf>, %1, %cst [0] : vector<4x256xf32> to vector<256xf32>
    %8 = vector.shape_cast %7 : vector<256xf32> to vector<1x256xf32>
    %9 = vector.broadcast %8 : vector<1x256xf32> to vector<4x256xf32>
    %10 = arith.subf %1, %9 : vector<4x256xf32>
    %11 = math.exp %10 : vector<4x256xf32>
    %cst_5 = arith.constant dense<0.000000e+00> : vector<256xf32>
    %12 = vector.multi_reduction <add>, %11, %cst_5 [0] : vector<4x256xf32> to vector<256xf32>
    %13 = vector.shape_cast %12 : vector<256xf32> to vector<1x256xf32>
    %14 = math.log %13 : vector<1x256xf32>
    %cst_6 = arith.constant 0.000000e+00 : f32
    %15 = vector.broadcast %cst_6 : f32 to vector<4x256xf32>
    %16 = arith.select %6, %10, %15 : vector<4x256xi1>, vector<4x256xf32>
    %cst_7 = arith.constant dense<0.000000e+00> : vector<256xf32>
    %17 = vector.multi_reduction <add>, %16, %cst_7 [0] : vector<4x256xf32> to vector<256xf32>
    %18 = vector.shape_cast %17 : vector<256xf32> to vector<1x256xf32>
    %19 = arith.subf %18, %14 : vector<1x256xf32>
    %20 = math.exp %19 : vector<1x256xf32>
    %cst_8 = arith.constant 1.000000e+00 : f32
    %21 = vector.broadcast %cst_8 : f32 to vector<1x256xf32>
    %22 = arith.subf %21, %20 : vector<1x256xf32>
    %23 = arith.mulf %22, %22 : vector<1x256xf32>
    %cst_9 = arith.constant 0.000000e+00 : f32
    %24 = vector.broadcast %cst_9 : f32 to vector<1x256xf32>
    %25 = arith.subf %24, %23 : vector<1x256xf32>
    %26 = arith.mulf %25, %19 : vector<1x256xf32>
    %c0_10 = arith.constant 0 : index
    %c0_11 = arith.constant 0 : index
    %27 = vector.load %arg4[%c0_10, %c0_11] : memref<4x1xf32, #tpu.memory_space<vmem>>, vector<4x1xf32>
    %cst_12 = arith.constant 0.000000e+00 : f32
    %28 = vector.shape_cast %27 : vector<4x1xf32> to vector<4x1xf32>
    %29 = vector.broadcast %28 : vector<4x1xf32> to vector<4x256xf32>
    %30 = vector.broadcast %cst_12 : f32 to vector<4x256xf32>
    %31 = arith.select %6, %29, %30 : vector<4x256xi1>, vector<4x256xf32>
    %cst_13 = arith.constant dense<0.000000e+00> : vector<256xf32>
    %32 = vector.multi_reduction <add>, %31, %cst_13 [0] : vector<4x256xf32> to vector<256xf32>
    %33 = vector.shape_cast %32 : vector<256xf32> to vector<1x256xf32>
    %34 = arith.mulf %26, %33 : vector<1x256xf32>
    %35 = tpu.iota {dimensions = array<i32: 1>} : vector<1x256xi32>
    %c256_i32 = arith.constant 256 : i32
    %36 = arith.muli %arg1, %c256_i32 : i32
    %37 = vector.broadcast %36 : i32 to vector<1x256xi32>
    %38 = arith.addi %35, %37 : vector<1x256xi32>
    %c256_i32_14 = arith.constant 256 : i32
    %39 = vector.broadcast %c256_i32_14 : i32 to vector<1x256xi32>
    %40 = arith.cmpi slt, %38, %39 : vector<1x256xi32>
    %cst_15 = arith.constant 0.000000e+00 : f32
    %41 = vector.broadcast %cst_15 : f32 to vector<1x256xf32>
    %42 = arith.select %40, %34, %41 : vector<1x256xi1>, vector<1x256xf32>
    %43 = vector.shape_cast %42 : vector<1x256xf32> to vector<1x1x256xf32>
    %cst_16 = arith.constant dense<0.000000e+00> : vector<1xf32>
    %44 = vector.multi_reduction <add>, %43, %cst_16 [1, 2] : vector<1x1x256xf32> to vector<1xf32>
    %45 = vector.shape_cast %44 : vector<1xf32> to vector<1x1x1xf32>
    %46 = vector.extract %45[0, 0, 0] : f32 from vector<1x1x1xf32>
    %47 = vector.broadcast %46 : f32 to vector<1x1xf32>
    %c0_17 = arith.constant 0 : index
    %c0_18 = arith.constant 0 : index
    %c0_19 = arith.constant 0 : index
    %c0_20 = arith.constant 0 : index
    %48 = vector.load %arg5[%c0_17, %c0_18, %c0_19, %c0_20] : memref<1x1x1x1xf32, #tpu.memory_space<vmem>>, vector<1x1x1x1xf32>
    %49 = vector.shape_cast %48 : vector<1x1x1x1xf32> to vector<1x1xf32>
    %50 = vector.shape_cast %47 : vector<1x1xf32> to vector<1x1x1x1xf32>
    tpu.vector_store %arg5[%c0_17, %c0_18, %c0_19, %c0_20], %50 {strides = array<i32>} : memref<1x1x1x1xf32, #tpu.memory_space<vmem>>, vector<1x1x1x1xf32>,
    return
  }
  func.func @transform_0(%arg0: i32, %arg1: i32) -> (i32, i32, i32) {
    %c0_i32 = arith.constant 0 : i32
    %c0_i32_0 = arith.constant 0 : i32
    return %arg0, %c0_i32, %arg1 : i32, i32, i32
  }
  func.func @transform_1(%arg0: i32, %arg1: i32) -> (i32, i32, i32) {
    %c0_i32 = arith.constant 0 : i32
    %c0_i32_0 = arith.constant 0 : i32
    return %arg0, %c0_i32, %arg1 : i32, i32, i32
  }
  func.func @transform_2(%arg0: i32, %arg1: i32) -> (i32, i32) {
    %c0_i32 = arith.constant 0 : i32
    %c0_i32_0 = arith.constant 0 : i32
    %c0_i32_1 = arith.constant 0 : i32
    return %c0_i32, %c0_i32_0 : i32, i32
  }
  func.func @transform_3(%arg0: i32, %arg1: i32) -> (i32, i32, i32, i32) {
    %c0_i32 = arith.constant 0 : i32
    %c0_i32_0 = arith.constant 0 : i32
    %c0_i32_1 = arith.constant 0 : i32
    return %arg0, %arg1, %c0_i32, %c0_i32_0 : i32, i32, i32, i32
  }
}

</mosaic_0001>

<bundles_post_ra>
// kernel: tpu_custom_call.1
= control target key start
LH: loop header
LB: loop body
LE: loop exit
PB: predicated region body
PF: predicated region fallthrough
CT: control target
= control target key end

     0   :  { %8 = vsyncpa [#allocation3], 0  ;;  %s816_s0 = inlined_call_operand.vmem [shape: s32[2,1,256], index: 0, kind: input, shape index: {}]   ;;  %s817_s1 = inlined_call_operand.hbm [shape: f32[2,4,256], index: 1, kind: input, shape index: {}]   ;;  %s818_s2 = inlined_call_operand.vmem [shape: f32[4,1], index: 2, kind: input, shape index: {}]   ;;  %s819_s3 = inlined_call_operand.vmem [shape: f32[2,1,1,1], index: 3, kind: output, shape index: {}]  }
   0x1   :  { %10 = vsyncpa [#allocation3 + $0x1], 0  ;;  %s669_s12 = smov 0   ;;  %s671_s13 = smov 0  }
   0x2   :  { %s673_s14 = smov 0   ;;  %s675_s15 = smov 0  }
   0x3   :  { %s677_s16 = smov 0   ;;  %s679_s17 = smov 0  }
   0x4 LB: > { %s482_s18 = sadd.s32 4294967295, %s645_s17   ;;  %s28_s19 = sadd.s32 1, %s641_s16  ;;  %s645_s17 = sphi %s679_s17, %s16_s17   ;;  %s641_s16 = sphi %s677_s16, %s829_s16   ;;  %s637_s15 = sphi %s675_s15, %s828_s15   ;;  %s633_s14 = sphi %s673_s14, %s827_s14   ;;  %s629_s13 = sphi %s671_s13, %s826_s13   ;;  %s625_s12 = sphi %s669_s12, %s825_s12  }
   0x5   : > { %p30_p0 = scmp.ge.s32.totalorder %s28_s19, 2  ;;  %s65_s20 = sadd.s32 1, %s633_s14 }
   0x6   : > { %p72_p1 = scmp.ne.s32.totalorder %s633_s14, %s629_s13  ;;  %p73_p2 = scmp.eq.s32.totalorder %s645_s17, 0 }
   0x7   : > { %s831_s19 = smov (%p30_p0, %s28_s19), 0  ;;  %p78_p4 = scmp.ne.s32.totalorder %s629_s13, %s625_s12 }
   0x8   : > { %p705_p3 = por %p73_p2, %p72_p1  ;;  %s60_s22 = ssub.s32 %s641_s16, %s831_s19 }
   0x9   : > { %p79_p5 = scmp.eq.s32.totalorder %s482_s18, 0  ;;  %p63_p6 = scmp.eq.s32.totalorder %s60_s22, 0 }
   0xa   : > { %p503_p8 = scmp.lt.s32.totalorder %s645_s17, 2  ;;  %s166_s25 = sand.u32 1, %s633_s14  }
   0xb   : > { %p712_p7 = por %p79_p5, %p78_p4  ;;  %s494_s26 = sshll.u32 %s641_s16, 7 }
   0xc   : > { %s718_s24 = scalar_select %p63_p6, %s633_s14, %s65_s20  }
   0xd   : > { %s486_s27 = sshll.u32 %s166_s25, 3  ;;  %s725_s30 = scalar_lea.hbm %s817_s1, %s494_s26 }
   0xe   : > { %s170_s4 = scalar_lea.vmem [#allocation2], %s486_s27  ;;  %p729_p9 = pnand %p503_p8, %p705_p3 }
   0xf   : > { %s180_s5 = sshll.u32 %s170_s4, 4  ;;  %s167_s7 = scalar_lea.sflag [#allocation3], %s166_s25  ;;  %s733_s5 = int_to_ptr.vmem [resolvable:$true] %s180_s5 }
  0x10   : > { %s565_s8 = scalar_lea.hbm %s725_s30, 128  ;;  %p567_p13 = pneg %p729_p9 }
  0x11   : > { %p566_p12 = scmp.ne.s32.totalorder %s725_s30, %s565_s8  ;;  %s570_s11 = scalar_lea.hbm %s817_s1, 256 }
  0x12   : > { %p571_p2 = scmp.lt.u32.totalorder %s725_s30, %s817_s1  ;;  %p572_p3 = scmp.lt.u32.totalorder %s570_s11, %s565_s8 }
  0x13   : > { %p568_p0 = pnand %p567_p13, %p566_p12  ;;  %p574_p5 = scmp.lt.u32.totalorder %s565_s8, %s725_s30 }
  0x14   : > { %p573_p4 = por %p572_p3, %p571_p2 }
  0x15   : > { %p569_p1 = pneg %p568_p0 }
  0x16   : > { %p575_p6 = por %p574_p5, %p573_p4 }
  0x18   : > { %p576_p8 = pnand %p575_p6, %p569_p1 }
  0x1a   : > { %579 = shalt.err (!%p576_p8)
}
  0x1b   : > { %s580_s20 = scalar_lea.vmem %s733_s5, 128  ;;  %s647_s21 = smov [#allocation2]  }
  0x1c   : > { %p581_p12 = scmp.ne.s32.totalorder %s733_s5, %s580_s20  ;;  %s585_s22 = sshll.u32 %s647_s21, 4  ;;  %s586_s22 = int_to_ptr.vmem [resolvable:$false] %s585_s22 }
  0x1d   : > { %s587_s25 = scalar_lea.vmem %s586_s22, 256  ;;  %p588_p11 = scmp.lt.s32.totalorder %s733_s5, %s586_s22 }
  0x1e   : > { %p583_p0 = pnand %p581_p12, %p567_p13  ;;  %p589_p2 = scmp.lt.s32.totalorder %s587_s25, %s580_s20 }
  0x20   : > { %p584_p10 = pneg %p583_p0  ;;  %p590_p3 = por %p589_p2, %p588_p11 }
  0x22   : > { %p591_p4 = pnand %p590_p3, %p584_p10 }
  0x24   : > { %594 = shalt.err (!%p591_p4)
}
  0x25   : > { %502 = dma.hbm_to_vmem [thread:$0]  (!%p729_p9), %s725_s30, 128, %s733_s5, %s167_s7  }
  0x26   : > { %p823_p1 = scmp.lt.s32.totalorder %s645_s17, 3  ;;  %p824_p5 = scmp.ge.s32.totalorder %s645_s17, 1 }
  0x28   : > { %p186_p13 = pnand %p824_p5, %p823_p1 }
  0x29   : > { %s191_s26 = sand.u32 (!%p186_p13), 1, %s629_s13  }
  0x2a   : > { %189 = sbr.rel (%p186_p13) target bundleno = 405 (0x195), region = 32  ;;  %s490_s27 = sshll.u32 (!%p186_p13), %s191_s26, 3 }
  0x2b   : > { %s192_s28 = scalar_lea.sflag (!%p186_p13), [#allocation3], %s191_s26  ;;  %s195_s29 = scalar_lea.vmem (!%p186_p13), [#allocation2], %s490_s27 }
  0x31   : > { %620 = dma.done.wait (%p712_p7), %s192_s28, 128  }
  0x32   : > { %622 = vsyncadd (%p712_p7), %s192_s28, 4294967168  ;;  %v648_v0 = vmov 0   ;;  %v336_v1 = vld [vmem:[%s818_s2] sm:$0xf]  ;;  %vm260_vm0 = vcmask 1043456   ;;  %p228_p7 = scmp.lt.s32.totalorder %s637_s15, 1  ;;  %v245_v22 = vlaneseq }
  0x33   : > { %553 = vset.pattern.permute.xlu0 %v648_v0  ;;  %v243_v2 = vld [vmem:[%s195_s29] sm:$0xff]  ;;  %vm371_vm3 = vcmask 1040384   ;;  %vm385_vm4 = vcmask 0  }
  0x34   : > { %339 = vperm.xlu0 %553, %v336_v1   ;;  %v258_v3 = vcombine.high %v243_v2, %v243_v2  ;;  %v261_v4 = vsel %vm260_vm0, %v243_v2, -inf  ;;  %s833_s15 = smov (!%p228_p7, %s637_s15), 1  ;;  %v246_v24 = vshrl.u32 %v245_v22, 7 }
  0x35   : > { %v262_v6 = vrot.slane %v261_v4, 4  ;;  %s491_s23 = sshll.u32 %s833_s15, 1  ;;  %s242_s10 = scalar_lea.vmem %s819_s3, %s833_s15 }
  0x36   : > { %v268_v5 = vsel %vm260_vm0, %v258_v3, -inf  ;;  %s234_s7 = scalar_lea.vmem %s816_s0, %s491_s23  ;;  %v249_v27 = vsub.s32 0, %v246_v24  ;;  %v253_v29 = vsub.s32 1, %v246_v24 }
  0x37   : > { %v269_v7 = vrot.slane %v268_v5, 4  ;;  %v263_v8 = vmax.f32 %v261_v4, %v262_v6  ;;  %v244_v30 = vld [vmem:[%s234_s7] sm:$0x3] }
  0x38   : > { %v250_v32 = vrot.slane %v244_v30, %v249_v27  ;;  %v254_v34 = vrot.slane %v244_v30, %v253_v29 }
  0x39   : > { %v270_v9 = vmax.f32 %v268_v5, %v269_v7  ;;  %v264_v10 = vrot.slane %v263_v8, 2 }
  0x3a   : > { %vm255_vm1 = vcmp.eq.s32.totalorder %v246_v24, %v250_v32  ;;  %vm256_vm2 = vcmp.eq.s32.totalorder %v246_v24, %v254_v34 }
  0x3b   : > { %v271_v11 = vrot.slane %v270_v9, 2  ;;  %v265_v12 = vmax.f32 %v263_v8, %v264_v10 }
  0x3d   : > { %v272_v13 = vmax.f32 %v270_v9, %v271_v11  ;;  %v266_v14 = vrot.slane %v265_v12, 1 }
  0x3f   : > { %v273_v15 = vrot.slane %v272_v13, 1  ;;  %v267_v16 = vmax.f32 %v265_v12, %v266_v14 }
  0x41   : > { %v274_v17 = vmax.f32 %v272_v13, %v273_v15 }
  0x43   : > { %v277_v18 = vcombine.low %v267_v16, %v274_v17 }
  0x45   : > { %v279_v19 = vsub.f32 %v243_v2, %v277_v18 }
  0x47   : > { %v280_v20 = vmul.f32 1.442695, %v279_v19  ;;  %v304_v36 = vcombine.high %v279_v19, %v279_v19  ;;  %v306_v39 = vsel %vm255_vm1, %v279_v19, 0.0 }
  0x48   : > { %v308_v43 = vsel %vm260_vm0, %v306_v39, 0.0 }
  0x49   : > { %555 = vpow2.f32 %v280_v20  ;;  %v307_v40 = vsel %vm256_vm2, %v304_v36, 0.0  ;;  %v309_v46 = vrot.slane %v308_v43, 4 }
  0x4a   : > { %v315_v44 = vsel %vm260_vm0, %v307_v40, 0.0 }
  0x4b   : > { %v316_v48 = vrot.slane %v315_v44, 4  ;;  %v310_v50 = vadd.f32 %v309_v46, %v308_v43 }
  0x4d   : > { %v317_v52 = vadd.f32 %v316_v48, %v315_v44  ;;  %v311_v53 = vrot.slane %v310_v50, 2 }
  0x4f   : > { %v318_v54 = vrot.slane %v317_v52, 2  ;;  %v312_v55 = vadd.f32 %v311_v53, %v310_v50 }
  0x51   : > { %v319_v56 = vadd.f32 %v318_v54, %v317_v52  ;;  %v313_v57 = vrot.slane %v312_v55, 1 }
  0x53   : > { %v556_v21 = vpop.eup %555  ;;  %v320_v59 = vrot.slane %v319_v56, 1  ;;  %v314_v61 = vadd.f32 %v313_v57, %v312_v55 }
  0x54   : > { %v283_v23 = vcombine.high %v556_v21, %v556_v21  ;;  %v285_v25 = vsel %vm260_vm0, %v556_v21, 0.0 }
  0x55   : > { %v286_v28 = vrot.slane %v285_v25, 4  ;;  %v321_v63 = vadd.f32 %v320_v59, %v319_v56 }
  0x56   : > { %v292_v26 = vsel %vm260_vm0, %v283_v23, 0.0 }
  0x57   : > { %v293_v31 = vrot.slane %v292_v26, 4  ;;  %v287_v33 = vadd.f32 %v286_v28, %v285_v25 }
  0x59   : > { %v294_v35 = vadd.f32 %v293_v31, %v292_v26  ;;  %v288_v37 = vrot.slane %v287_v33, 2 }
  0x5b   : > { %v295_v38 = vrot.slane %v294_v35, 2  ;;  %v289_v41 = vadd.f32 %v288_v37, %v287_v33 }
  0x5d   : > { %v296_v42 = vadd.f32 %v295_v38, %v294_v35  ;;  %v290_v45 = vrot.slane %v289_v41, 1 }
  0x5f   : > { %v297_v47 = vrot.slane %v296_v42, 1  ;;  %v291_v49 = vadd.f32 %v290_v45, %v289_v41 }
  0x61   : > { %v298_v51 = vadd.f32 %v297_v47, %v296_v42  ;;  %557 = vlog2.f32 %v291_v49 }
  0x63   : > { %559 = vlog2.f32 %v298_v51 }
  0x6b   : > { %v558_v58 = vpop.eup %557 }
  0x6c   : > { %v300_v62 = vmul.f32 0.6931472, %v558_v58 }
  0x6d   : > { %v560_v60 = vpop.eup %559 }
  0x6e   : > { %v302_v0 = vmul.f32 0.6931472, %v560_v60  ;;  %v322_v1 = vsub.f32 %v314_v61, %v300_v62 }
  0x70   : > { %v323_v2 = vsub.f32 %v321_v63, %v302_v0  ;;  %v324_v3 = vmul.f32 1.442695, %v322_v1 }
  0x72   : > { %v326_v4 = vmul.f32 1.442695, %v323_v2  ;;  %561 = vpow2.f32 %v324_v3 }
  0x74   : > { %563 = vpow2.f32 %v326_v4 }
  0x7c   : > { %v562_v5 = vpop.eup %561 }
  0x7d   : > { %v328_v7 = vsub.f32 1.0, %v562_v5 }
  0x7e   : > { %v564_v6 = vpop.eup %563 }
  0x7f   : > { %v329_v8 = vsub.f32 1.0, %v564_v6  ;;  %v330_v16 = vmul.f32 %v328_v7, %v328_v7 }
  0x81   : > { %v331_v17 = vmul.f32 %v329_v8, %v329_v8  ;;  %v332_v22 = vsub.f32 0.0, %v330_v16 }
  0x83   : > { %v333_v23 = vsub.f32 0.0, %v331_v17  ;;  %v334_v24 = vmul.f32 %v332_v22, %v322_v1 }
  0x85   : > { %v335_v29 = vmul.f32 %v333_v23, %v323_v2 }
  0xb3   : > { %v340_v9 = vpop.permute.xlu0 %339 }
  0xb4   : > { %v342_v10 = vsel %vm255_vm1, %v340_v9, 0.0  ;;  %v343_v11 = vsel %vm256_vm2, %v340_v9, 0.0 }
  0xb5   : > { %v344_v12 = vsel %vm260_vm0, %v342_v10, 0.0  ;;  %v351_v13 = vsel %vm260_vm0, %v343_v11, 0.0 }
  0xb6   : > { %v345_v14 = vrot.slane %v344_v12, 4  ;;  %v352_v15 = vrot.slane %v351_v13, 4 }
  0xb8   : > { %v346_v18 = vadd.f32 %v345_v14, %v344_v12  ;;  %v353_v19 = vadd.f32 %v352_v15, %v351_v13 }
  0xba   : > { %v347_v20 = vrot.slane %v346_v18, 2  ;;  %v354_v21 = vrot.slane %v353_v19, 2 }
  0xbc   : > { %v348_v25 = vadd.f32 %v347_v20, %v346_v18  ;;  %v355_v26 = vadd.f32 %v354_v21, %v353_v19 }
  0xbe   : > { %v349_v27 = vrot.slane %v348_v25, 1  ;;  %v356_v28 = vrot.slane %v355_v26, 1 }
  0xc0   : > { %v350_v30 = vadd.f32 %v349_v27, %v348_v25  ;;  %v357_v31 = vadd.f32 %v356_v28, %v355_v26 }
  0xc2   : > { %v358_v32 = vmul.f32 %v350_v30, %v334_v24  ;;  %v359_v33 = vmul.f32 %v357_v31, %v335_v29 }
  0xc4   : > { %v372_v34 = vsel %vm371_vm3, %v358_v32, 0.0  ;;  %v373_v35 = vsel %vm371_vm3, %v359_v33, 0.0 }
  0xc5   : > { %v374_v36 = vadd.f32 %v373_v35, %v372_v34 }
  0xc7   : > { %375 = vadd.xlane.f32.xlu0 %v374_v36 }
 0x154   : > { %v376_v37 = vpop.xlane.xlu0 %375 }
 0x155   : > { %v377_v38 = vrot.slane %v376_v37, 4 }
 0x157   : > { %v378_v39 = vadd.f32 %v377_v38, %v376_v37 }
 0x159   : > { %v379_v40 = vrot.slane %v378_v39, 2 }
 0x15b   : > { %v380_v41 = vadd.f32 %v379_v40, %v378_v39 }
 0x15d   : > { %v381_v42 = vrot.slane %v380_v41, 1 }
 0x15f   : > { %v382_v43 = vadd.f32 %v381_v42, %v380_v41 }
 0x161   : > { %495 = vpush %v382_v43 }
 0x192   : > { %s496_s11 = spop %495 }
 0x193   : > { %v384_v44 = vstv %s496_s11 }
 0x194   : > { %386 = vst.msk [vmem:[%s242_s10] sm:$0x1] %vm385_vm4, %v384_v44 }
 0x195 PF: > { %s16_s17 = sadd.s32 1, %s645_s17   ;;  %s825_s12 = smov %s629_s13 }
 0x196   : > { %p13_p9 = scmp.ge.s32.totalorder %s16_s17, 4   ;;  %s826_s13 = smov %s633_s14 }
 0x197   : > { %s827_s14 = smov %s718_s24  ;;  %s828_s15 = smov %s641_s16 }
 0x198   : > { %s829_s16 = smov %s831_s19  ;;  %15 = sbr.rel (!%p13_p9) target bundleno = 4 (0x4), region = 75 }
 0x19f   :  { %410 = vsyncpa [#allocation3], 1 }
 0x1a0   :  { %412 = vsyncpa [#allocation3 + $0x1], 1 }

</bundles_post_ra>
